<compile_context>
chip_gen: v7x
topology: tpu7x:2x2x1
jax: 0.10.0
libtpu: 0.0.40
codegen_flags: <defaults>
</compile_context>

<pallas_src>
import functools

import jax
import jax.numpy as jnp
from jax.experimental import pallas as pl
from jax.experimental.pallas import tpu as pltpu

BETA_ELBO = 0.1


def _elbo_kernel(pred_ref, tgt_ref, mu_ref, logvar_ref, out_ref, acc_ref,
                 *, inv_n, inv_b, beta):
    """Grid axis 0 walks batch tiles of pred/tgt; mu/logvar are resident."""
    i = pl.program_id(0)

    # ---- init accumulator on the first tile ----
    @pl.when(i == 0)
    def _():
        acc_ref[0, 0] = jnp.float32(0.0)

    # ---- streamed sum of squared errors for this batch tile ----
    diff = pred_ref[...].astype(jnp.float32) - tgt_ref[...].astype(jnp.float32)
    acc_ref[0, 0] += jnp.sum(diff * diff)

    # ---- finalize on the last tile: KL term + scaling ----
    @pl.when(i == pl.num_programs(0) - 1)
    def _():
        mu = mu_ref[...].astype(jnp.float32)
        logvar = logvar_ref[...].astype(jnp.float32)
        # sum over latent dim then mean over batch == total sum * (1/B)
        kl_terms = 1.0 + logvar - mu * mu - jnp.exp(logvar)     # (B, L)
        kl_mean = jnp.float32(-0.5) * jnp.sum(kl_terms) * jnp.float32(inv_b)
        recon = acc_ref[0, 0] * jnp.float32(inv_n)
        out_ref[0, 0] = recon + jnp.float32(beta) * kl_mean


def _choose_tile_rows(batch, row_bytes, target_bytes=2 << 20):
    """Largest multiple-of-8 row count that divides `batch` and keeps one
    streamed tile around ~2 MiB (double-buffered x 2 inputs stays well under
    the scoped VMEM limit on all generations, incl. v7x's 64 MiB)."""
    rows = int(max(1, target_bytes // max(1, row_bytes)))
    rows = min(rows, batch)
    rows = (rows // 8) * 8
    while rows >= 8 and batch % rows != 0:
        rows -= 8
    if rows < 8:
        rows = batch  # no clean multiple-of-8 tiling; use one block
    return rows


def elbo_loss(pred_spectra, train_spectra, mu, logvar, *,
              beta=BETA_ELBO, tile_rows=None):
    """Scalar float32 loss identical to ELBOLoss.forward."""
    B, S = pred_spectra.shape
    Bm, L = mu.shape

    if tile_rows is None:
        tile_rows = _choose_tile_rows(B, S * pred_spectra.dtype.itemsize)
    if B % tile_rows != 0:
        tile_rows = B  # fall back to a single block for odd batch sizes
    grid = (B // tile_rows,)

    kernel = functools.partial(
        _elbo_kernel,
        inv_n=1.0 / float(B * S),   # MSE mean over ALL elements of pred
        inv_b=1.0 / float(Bm),      # KL mean over batch
        beta=float(beta),
    )

    out = pl.pallas_call(
        kernel,
        out_shape=jax.ShapeDtypeStruct((1, 1), jnp.float32),
        grid=grid,
        in_specs=[
            pl.BlockSpec((tile_rows, S), lambda i: (i, 0)),   # pred tiles
            pl.BlockSpec((tile_rows, S), lambda i: (i, 0)),   # target tiles
            pl.BlockSpec((Bm, L), lambda i: (0, 0)),          # mu (resident)
            pl.BlockSpec((Bm, L), lambda i: (0, 0)),          # logvar (resident)
        ],
        out_specs=pl.BlockSpec(memory_space=pltpu.MemorySpace.SMEM),
        scratch_shapes=[pltpu.SMEM((1, 1), jnp.float32)],     # running SSE
        compiler_params=pltpu.CompilerParams(
            dimension_semantics=("arbitrary",),               # reduction axis
            vmem_limit_bytes=64 << 20,
        ),
    )(pred_spectra, train_spectra, mu, logvar)
    return out[0, 0]


def elbo_loss_ref(pred_spectra, train_spectra, mu, logvar, beta=BETA_ELBO):
    """Pure-JAX reference for correctness checking."""
    recon = jnp.mean((pred_spectra.astype(jnp.float32)
                      - train_spectra.astype(jnp.float32)) ** 2)
    lv = logvar.astype(jnp.float32)
    m = mu.astype(jnp.float32)
    kl = -0.5 * jnp.sum(1.0 + lv - m * m - jnp.exp(lv), axis=-1)
    return recon + beta * jnp.mean(kl)


if __name__ == "__main__":
    # Small synthetic shapes: batch=16, spectrum length=256, latent dim=32.
    B, S, L = 16, 256, 32
    key = jax.random.PRNGKey(0)
    k1, k2, k3, k4 = jax.random.split(key, 4)

    pred_spectra = jax.random.normal(k1, (B, S), dtype=jnp.float32)
    train_spectra = jax.random.normal(k2, (B, S), dtype=jnp.float32)
    mu = 0.5 * jax.random.normal(k3, (B, L), dtype=jnp.float32)
    logvar = 0.3 * jax.random.normal(k4, (B, L), dtype=jnp.float32)

    # tile_rows=8 -> 2-step grid so the accumulate/finalize path is exercised.
    loss = elbo_loss(pred_spectra, train_spectra, mu, logvar, tile_rows=8)
    jax.block_until_ready(loss)

    ref = elbo_loss_ref(pred_spectra, train_spectra, mu, logvar)
    assert jnp.allclose(loss, ref, rtol=1e-5, atol=1e-5), (loss, ref)

    print("KERNEL_OK")
</pallas_src>

<mosaic_0001>
module attributes {stable_mosaic.version = 11 : i64} {
  func.func @_elbo_kernel(%arg0: i32, %arg1: memref<8x256xf32, #tpu.memory_space<vmem>>, %arg2: memref<8x256xf32, #tpu.memory_space<vmem>>, %arg3: memref<16x32xf32, #tpu.memory_space<vmem>>, %arg4: memref<16x32xf32, #tpu.memory_space<vmem>>, %arg5: memref<1x1xf32, #tpu.memory_space<smem>>, %arg6: memref<1x1xf32, #tpu.memory_space<smem>>) attributes {dimension_semantics = [#tpu.dimension_semantics<arbitrary>], iteration_bounds = array<i64: 2>, scalar_prefetch = 0 : i64, scratch_operands = 1 : i64, tpu.core_type = #tpu.core_type<tc>, window_params = [{transform_indices = @transform_0, window_bounds = array<i64: 8, 256>}, {transform_indices = @transform_1, window_bounds = array<i64: 8, 256>}, {pipeline_mode = #tpu.pipeline_mode<synchronous>, transform_indices = @transform_2, window_bounds = array<i64: 16, 32>}, {pipeline_mode = #tpu.pipeline_mode<synchronous>, transform_indices = @transform_3, window_bounds = array<i64: 16, 32>}, {transform_indices = @transform_4, window_bounds = array<i64: 1, 1>}]} {
    %c0_i32 = arith.constant 0 : i32
    %0 = arith.cmpi eq, %arg0, %c0_i32 : i32
    %1 = arith.extui %0 : i1 to i32
    %c0_i32_0 = arith.constant 0 : i32
    %2 = arith.cmpi ne, %1, %c0_i32_0 : i32
    scf.if %2 {
      %cst_9 = arith.constant 0.000000e+00 : f32
      %c0_10 = arith.constant 0 : index
      %c0_11 = arith.constant 0 : index
      %17 = memref.load %arg6[%c0_10, %c0_11] : memref<1x1xf32, #tpu.memory_space<smem>>
      memref.store %cst_9, %arg6[%c0_10, %c0_11] : memref<1x1xf32, #tpu.memory_space<smem>>
    } else {
    }
    %c0 = arith.constant 0 : index
    %c0_1 = arith.constant 0 : index
    %3 = vector.load %arg1[%c0, %c0_1] : memref<8x256xf32, #tpu.memory_space<vmem>>, vector<8x256xf32>
    %c0_2 = arith.constant 0 : index
    %c0_3 = arith.constant 0 : index
    %4 = vector.load %arg2[%c0_2, %c0_3] : memref<8x256xf32, #tpu.memory_space<vmem>>, vector<8x256xf32>
    %5 = arith.subf %3, %4 : vector<8x256xf32>
    %c0_4 = arith.constant 0 : index
    %c0_5 = arith.constant 0 : index
    %6 = memref.load %arg6[%c0_4, %c0_5] : memref<1x1xf32, #tpu.memory_space<smem>>
    %7 = arith.mulf %5, %5 : vector<8x256xf32>
    %8 = vector.shape_cast %7 : vector<8x256xf32> to vector<1x8x256xf32>
    %cst = arith.constant dense<0.000000e+00> : vector<1xf32>
    %9 = vector.multi_reduction <add>, %8, %cst [1, 2] : vector<1x8x256xf32> to vector<1xf32>
    %10 = vector.shape_cast %9 : vector<1xf32> to vector<1x1x1xf32>
    %11 = vector.extract %10[0, 0, 0] : f32 from vector<1x1x1xf32>
    %12 = arith.addf %6, %11 : f32
    %c0_6 = arith.constant 0 : index
    %c0_7 = arith.constant 0 : index
    %13 = memref.load %arg6[%c0_6, %c0_7] : memref<1x1xf32, #tpu.memory_space<smem>>
    memref.store %12, %arg6[%c0_6, %c0_7] : memref<1x1xf32, #tpu.memory_space<smem>>
    %c1_i32 = arith.constant 1 : i32
    %14 = arith.cmpi eq, %arg0, %c1_i32 : i32
    %15 = arith.extui %14 : i1 to i32
    %c0_i32_8 = arith.constant 0 : i32
    %16 = arith.cmpi ne, %15, %c0_i32_8 : i32
    scf.if %16 {
      %c0_9 = arith.constant 0 : index
      %c0_10 = arith.constant 0 : index
      %17 = vector.load %arg3[%c0_9, %c0_10] : memref<16x32xf32, #tpu.memory_space<vmem>>, vector<16x32xf32>
      %c0_11 = arith.constant 0 : index
      %c0_12 = arith.constant 0 : index
      %18 = vector.load %arg4[%c0_11, %c0_12] : memref<16x32xf32, #tpu.memory_space<vmem>>, vector<16x32xf32>
      %cst_13 = arith.constant 1.000000e+00 : f32
      %19 = vector.broadcast %cst_13 : f32 to vector<16x32xf32>
      %20 = arith.addf %19, %18 : vector<16x32xf32>
      %21 = arith.mulf %17, %17 : vector<16x32xf32>
      %22 = arith.subf %20, %21 : vector<16x32xf32>
      %23 = math.exp %18 : vector<16x32xf32>
      %24 = arith.subf %22, %23 : vector<16x32xf32>
      %25 = vector.shape_cast %24 : vector<16x32xf32> to vector<1x16x32xf32>
      %cst_14 = arith.constant dense<0.000000e+00> : vector<1xf32>
      %26 = vector.multi_reduction <add>, %25, %cst_14 [1, 2] : vector<1x16x32xf32> to vector<1xf32>
      %27 = vector.shape_cast %26 : vector<1xf32> to vector<1x1x1xf32>
      %28 = vector.extract %27[0, 0, 0] : f32 from vector<1x1x1xf32>
      %cst_15 = arith.constant -5.000000e-01 : f32
      %29 = arith.mulf %cst_15, %28 : f32
      %cst_16 = arith.constant 6.250000e-02 : f32
      %30 = arith.mulf %29, %cst_16 : f32
      %c0_17 = arith.constant 0 : index
      %c0_18 = arith.constant 0 : index
      %31 = memref.load %arg6[%c0_17, %c0_18] : memref<1x1xf32, #tpu.memory_space<smem>>
      %cst_19 = arith.constant 2.44140625E-4 : f32
      %32 = arith.mulf %31, %cst_19 : f32
      %cst_20 = arith.constant 1.000000e-01 : f32
      %33 = arith.mulf %cst_20, %30 : f32
      %34 = arith.addf %32, %33 : f32
      %c0_21 = arith.constant 0 : index
      %c0_22 = arith.constant 0 : index
      %35 = memref.load %arg5[%c0_21, %c0_22] : memref<1x1xf32, #tpu.memory_space<smem>>
      memref.store %34, %arg5[%c0_21, %c0_22] : memref<1x1xf32, #tpu.memory_space<smem>>
    } else {
    }
    return
  }
  func.func @transform_0(%arg0: i32) -> (i32, i32) {
    %c0_i32 = arith.constant 0 : i32
    %c0_i32_0 = arith.constant 0 : i32
    return %arg0, %c0_i32 : i32, i32
  }
  func.func @transform_1(%arg0: i32) -> (i32, i32) {
    %c0_i32 = arith.constant 0 : i32
    %c0_i32_0 = arith.constant 0 : i32
    return %arg0, %c0_i32 : i32, i32
  }
  func.func @transform_2(%arg0: i32) -> (i32, i32) {
    %c0_i32 = arith.constant 0 : i32
    %c0_i32_0 = arith.constant 0 : i32
    %c0_i32_1 = arith.constant 0 : i32
    return %c0_i32, %c0_i32_0 : i32, i32
  }
  func.func @transform_3(%arg0: i32) -> (i32, i32) {
    %c0_i32 = arith.constant 0 : i32
    %c0_i32_0 = arith.constant 0 : i32
    %c0_i32_1 = arith.constant 0 : i32
    return %c0_i32, %c0_i32_0 : i32, i32
  }
  func.func @transform_4(%arg0: i32) -> (i32, i32) {
    %c0_i32 = arith.constant 0 : i32
    %c0_i32_0 = arith.constant 0 : i32
    %c0_i32_1 = arith.constant 0 : i32
    return %c0_i32, %c0_i32_0 : i32, i32
  }
}

</mosaic_0001>

<bundles_post_ra>
// kernel: tpu_custom_call.1
= control target key start
LH: loop header
LB: loop body
LE: loop exit
PB: predicated region body
PF: predicated region fallthrough
CT: control target
= control target key end

     0   :  { %9 = vsyncpa [#allocation4], 0  ;;  %s980_s0 = inlined_call_operand.hbm [shape: f32[16,256], index: 0, kind: input, shape index: {}]   ;;  %s981_s1 = inlined_call_operand.hbm [shape: f32[16,256], index: 1, kind: input, shape index: {}]   ;;  %s982_s2 = inlined_call_operand.hbm [shape: f32[16,32], index: 2, kind: input, shape index: {}]   ;;  %s983_s3 = inlined_call_operand.hbm [shape: f32[16,32], index: 3, kind: input, shape index: {}]   ;;  %s984_s4 = inlined_call_operand.hbm [shape: f32[1,1], index: 4, kind: output, shape index: {}]  }
   0x1   :  { %11 = vsyncpa [#allocation4 + $0x1], 0 }
   0x2   :  { %12 = vsyncpa [#allocation7], 0 }
   0x3   :  { %14 = vsyncpa [#allocation7 + $0x1], 0 }
   0x4   :  { %15 = vsyncpa [#allocation10], 0 }
   0x5   :  { %16 = vsyncpa [#allocation5], 0  ;;  %s759_s15 = smov 0   ;;  %s761_s16 = smov 0  }
   0x6   :  { %s763_s17 = smov 0   ;;  %s765_s18 = smov 0  }
   0x7 LB: > { %s778_s19 = sadd.s32 4294967295, %s724_s18   ;;  %p42_p0 = scmp.ne.s32.totalorder %s716_s16, %s712_s15  ;;  %s724_s18 = sphi %s765_s18, %s1002_s18   ;;  %s720_s17 = sphi %s763_s17, %s1001_s17   ;;  %s716_s16 = sphi %s761_s16, %s1000_s16   ;;  %s712_s15 = sphi %s759_s15, %s999_s15  }
   0x8   : > { %p985_p1 = scmp.eq.s32.totalorder %s778_s19, 0  ;;  %p437_p2 = scmp.ge.s32.totalorder %s724_s18, 1 }
   0x9   : > { %p142_p3 = scmp.lt.s32.totalorder %s724_s18, 3  ;;  %s726_s22 = smov [#allocation8]  }
   0xa   : > { %p786_p4 = por %p985_p1, %p42_p0  ;;  %s154_s23 = sshll.u32 %s726_s22, 4  ;;  %s155_s23 = int_to_ptr.vmem [resolvable:$true] %s154_s23 }
   0xb   : > { %p790_p5 = pnand %p437_p2, %p142_p3  ;;  %s727_s25 = smov [#allocation9]  }
   0xc   : > { %s988_s20 = scalar_select %p786_p4, 1, 0 }
   0xd   : > { %s989_s21 = scalar_select %p790_p5, 1, 0 }
   0xe   : > { %p482_p6 = pneg %p790_p5  ;;  %s167_s26 = sshll.u32 %s727_s25, 4  ;;  %s802_s26 = int_to_ptr.vmem [resolvable:$true] %s167_s26 }
   0xf   : > { %s546_s29 = scalar_lea.hbm %s982_s2, 256 }
  0x10   : > { %p798_p7 = pnand %p482_p6, %p985_p1  ;;  %p547_p8 = scmp.ne.s32.totalorder %s982_s2, %s546_s29 }
  0x11   : > { %p553_p12 = scmp.lt.u32.totalorder %s546_s29, %s982_s2 }
  0x12   : > { %p548_p9 = pneg %p798_p7 }
  0x14   : > { %p549_p10 = pnand %p548_p9, %p547_p8 }
  0x16   : > { %p550_p11 = pneg %p549_p10 }
  0x18   : > { %p555_p13 = pnand %p553_p12, %p550_p11 }
  0x1a   : > { %558 = shalt.err (!%p555_p13)
}
  0x1b   : > { %s559_s8 = scalar_lea.vmem %s155_s23, 256  ;;  %p567_p6 = scmp.lt.s32.totalorder %s155_s23, %s155_s23 }
  0x1c   : > { %p560_p0 = scmp.ne.s32.totalorder %s155_s23, %s559_s8  ;;  %p568_p1 = scmp.lt.s32.totalorder %s559_s8, %s559_s8 }
  0x1e   : > { %p562_p2 = pnand %p560_p0, %p548_p9  ;;  %p569_p4 = por %p568_p1, %p567_p6 }
  0x20   : > { %p563_p3 = pneg %p562_p2 }
  0x22   : > { %p570_p5 = pnand %p569_p4, %p563_p3 }
  0x24   : > { %573 = shalt.err (!%p570_p5)
}
  0x25   : > { %s728_s9 = smov 128   ;;  %s729_s10 = smov 8  }
  0x26   : > { %485 = dma.hbm_to_vmem [thread:$0]  (!%p798_p7), %s982_s2, 256, %s155_s23, [#allocation7], %s728_s9, %s728_s9, %s729_s10  }
  0x27   : > { %s574_s15 = scalar_lea.hbm %s983_s3, 256 }
  0x28   : > { %p575_p8 = scmp.ne.s32.totalorder %s983_s3, %s574_s15  ;;  %p581_p5 = scmp.lt.u32.totalorder %s574_s15, %s983_s3 }
  0x2a   : > { %p577_p1 = pnand %p575_p8, %p548_p9 }
  0x2c   : > { %p578_p4 = pneg %p577_p1 }
  0x2e   : > { %p583_p10 = pnand %p581_p5, %p578_p4 }
  0x30   : > { %586 = shalt.err (!%p583_p10)
}
  0x31   : > { %s587_s23 = scalar_lea.vmem %s802_s26, 256  ;;  %p595_p0 = scmp.lt.s32.totalorder %s802_s26, %s802_s26 }
  0x32   : > { %p588_p11 = scmp.ne.s32.totalorder %s802_s26, %s587_s23  ;;  %p596_p2 = scmp.lt.s32.totalorder %s587_s23, %s587_s23 }
  0x34   : > { %p590_p12 = pnand %p588_p11, %p548_p9  ;;  %p597_p3 = por %p596_p2, %p595_p0 }
  0x36   : > { %p591_p13 = pneg %p590_p12 }
  0x38   : > { %p598_p6 = pnand %p597_p3, %p591_p13 }
  0x3a   : > { %601 = shalt.err (!%p598_p6)
}
  0x3b   : > { %488 = dma.hbm_to_vmem [thread:$0]  (!%p798_p7), %s983_s3, 256, %s802_s26, [#allocation10], %s728_s9, %s728_s9, %s729_s10  }
  0x3c   : > { %s852_s5 = sadd.s32 1, %s724_s18   ;;  %s29_s6 = sadd.s32 1, %s720_s17 }
  0x3d   : > { %s26_s24 = ssub.s32 %s724_s18, %s852_s5  ;;  %p36_p9 = scmp.ne.s32.totalorder %s720_s17, %s716_s16 }
  0x3e   : > { %p27_p8 = scmp.eq.s32.totalorder %s26_s24, 0  ;;  %p37_p1 = scmp.eq.s32.totalorder %s724_s18, 0 }
  0x3f   : > { %p498_p4 = scmp.lt.s32.totalorder %s724_s18, 2  ;;  %s181_s7 = sand.u32 1, %s720_s17  }
  0x40   : > { %s863_s8 = scalar_select %p27_p8, %s720_s17, %s29_s6  }
  0x41   : > { %p38_p5 = por %p37_p1, %p36_p9  ;;  %s865_s11 = sshll.u32 %s181_s7, 4 }
  0x42   : > { %s458_s12 = sshll.u32 %s724_s18, 8  ;;  %s185_s9 = scalar_lea.vmem [#allocation3], %s865_s11 }
  0x43   : > { %s871_s26 = scalar_lea.hbm %s980_s0, %s458_s12  ;;  %s193_s10 = sshll.u32 %s185_s9, 4  ;;  %s878_s10 = int_to_ptr.vmem [resolvable:$true] %s193_s10 }
  0x44   : > { %p874_p7 = pnand %p498_p4, %p38_p5  ;;  %s883_s27 = scalar_lea.hbm %s981_s1, %s458_s12 }
  0x45   : > { %s182_s28 = scalar_lea.sflag [#allocation4], %s181_s7  ;;  %s602_s23 = scalar_lea.hbm %s871_s26, 256 }
  0x46   : > { %p603_p10 = scmp.ne.s32.totalorder %s871_s26, %s602_s23  ;;  %p604_p11 = pneg %p874_p7 }
  0x47   : > { %s607_s6 = scalar_lea.hbm %s980_s0, 512  ;;  %p608_p0 = scmp.lt.u32.totalorder %s871_s26, %s980_s0 }
  0x48   : > { %p605_p12 = pnand %p604_p11, %p603_p10  ;;  %p609_p2 = scmp.lt.u32.totalorder %s607_s6, %s602_s23 }
  0x49   : > { %p611_p6 = scmp.lt.u32.totalorder %s602_s23, %s871_s26 }
  0x4a   : > { %p606_p13 = pneg %p605_p12  ;;  %p610_p3 = por %p609_p2, %p608_p0 }
  0x4c   : > { %p612_p9 = por %p611_p6, %p610_p3 }
  0x4e   : > { %p613_p8 = pnand %p612_p9, %p606_p13 }
  0x50   : > { %616 = shalt.err (!%p613_p8)
}
  0x51   : > { %s617_s7 = scalar_lea.vmem %s878_s10, 256  ;;  %s730_s12 = smov [#allocation3]  }
  0x52   : > { %p618_p1 = scmp.ne.s32.totalorder %s878_s10, %s617_s7  ;;  %s622_s14 = sshll.u32 %s730_s12, 4  ;;  %s623_s14 = int_to_ptr.vmem [resolvable:$false] %s622_s14 }
  0x53   : > { %s624_s9 = scalar_lea.vmem %s623_s14, 512  ;;  %p625_p10 = scmp.lt.s32.totalorder %s878_s10, %s623_s14 }
  0x54   : > { %p620_p4 = pnand %p618_p1, %p604_p11  ;;  %p626_p12 = scmp.lt.s32.totalorder %s624_s9, %s617_s7 }
  0x56   : > { %p621_p5 = pneg %p620_p4  ;;  %p627_p0 = por %p626_p12, %p625_p10 }
  0x58   : > { %p628_p2 = pnand %p627_p0, %p621_p5 }
  0x5a   : > { %631 = shalt.err (!%p628_p2)
}
  0x5b   : > { %492 = dma.hbm_to_vmem [thread:$0]  (!%p874_p7), %s871_s26, 256, %s878_s10, %s182_s28  }
  0x5c   : > { %s200_s22 = sand.u32 1, %s724_s18   ;;  %s204_s25 = scalar_lea.vmem [#allocation6], %s865_s11 }
  0x5d   : > { %s212_s23 = sshll.u32 %s204_s25, 4  ;;  %s201_s29 = scalar_lea.sflag [#allocation7], %s200_s22  ;;  %s213_s23 = int_to_ptr.vmem [resolvable:$true] %s212_s23 }
  0x5e   : > { %s632_s30 = scalar_lea.hbm %s883_s27, 256  ;;  %s637_s13 = scalar_lea.hbm %s981_s1, 512 }
  0x5f   : > { %p633_p13 = scmp.ne.s32.totalorder %s883_s27, %s632_s30  ;;  %p638_p9 = scmp.lt.u32.totalorder %s883_s27, %s981_s1 }
  0x60   : > { %p639_p8 = scmp.lt.u32.totalorder %s637_s13, %s632_s30  ;;  %p641_p4 = scmp.lt.u32.totalorder %s632_s30, %s883_s27 }
  0x61   : > { %p635_p3 = pnand %p633_p13, %p604_p11 }
  0x62   : > { %p640_p1 = por %p639_p8, %p638_p9 }
  0x63   : > { %p636_p6 = pneg %p635_p3 }
  0x64   : > { %p642_p5 = por %p641_p4, %p640_p1 }
  0x66   : > { %p643_p10 = pnand %p642_p5, %p636_p6 }
  0x68   : > { %646 = shalt.err (!%p643_p10)
}
  0x69   : > { %s647_s18 = scalar_lea.vmem %s213_s23, 256  ;;  %s731_s11 = smov [#allocation6]  }
  0x6a   : > { %p648_p12 = scmp.ne.s32.totalorder %s213_s23, %s647_s18  ;;  %s652_s26 = sshll.u32 %s731_s11, 4  ;;  %s653_s26 = int_to_ptr.vmem [resolvable:$false] %s652_s26 }
  0x6b   : > { %s654_s10 = scalar_lea.vmem %s653_s26, 512  ;;  %p655_p13 = scmp.lt.s32.totalorder %s213_s23, %s653_s26 }
  0x6c   : > { %p650_p0 = pnand %p648_p12, %p604_p11  ;;  %p656_p3 = scmp.lt.s32.totalorder %s654_s10, %s647_s18 }
  0x6e   : > { %p651_p2 = pneg %p650_p0  ;;  %p657_p8 = por %p656_p3, %p655_p13 }
  0x70   : > { %p658_p9 = pnand %p657_p8, %p651_p2 }
  0x72   : > { %661 = shalt.err (!%p658_p9)
}
  0x73   : > { %495 = dma.hbm_to_vmem [thread:$0]  (!%p874_p7), %s883_s27, 256, %s213_s23, %s201_s29  }
  0x74   : > { %p992_p6 = scmp.ne.s32.totalorder %s989_s21, 0 }
  0x75   : > { %s223_s28 = sand.u32 (!%p992_p6), 1, %s716_s16   ;;  %p993_p11 = scmp.ne.s32.totalorder (!%p992_p6), %s988_s20, 0 }
  0x76   : > { %221 = sbr.rel (%p992_p6) target bundleno = 386 (0x182), region = 36  ;;  %s448_s14 = sshll.u32 (!%p992_p6), %s223_s28, 4 }
  0x77   : > { %s224_s9 = scalar_lea.sflag (!%p992_p6), [#allocation4], %s223_s28  ;;  %s227_s22 = scalar_lea.vmem (!%p992_p6), [#allocation3], %s448_s14 }
  0x7d   : > { %691 = dma.done.wait (%p993_p11), %s224_s9, 256  }
  0x7e   : > { %693 = vsyncadd (%p993_p11), %s224_s9, 4294967040  ;;  %s232_s25 = sand.u32 1, %s778_s19   ;;  %s236_s30 = scalar_lea.vmem [#allocation6], %s448_s14 }
  0x7f   : > { %s233_s15 = scalar_lea.sflag [#allocation7], %s232_s25 }
  0x80   : > { %695 = dma.done.wait (%p993_p11), %s233_s15, 256  }
  0x81   : > { %697 = vsyncadd (%p993_p11), %s233_s15, 4294967040  ;;  %p994_p7 = scmp.eq.s32.totalorder %s778_s19, 0 }
  0x83   : > { %699 = dma.done.wait (%p994_p7), [#allocation7], 256   ;;  %p995_p1 = pmov %p994_p7 }
  0x85   : > { %701 = vsyncadd (%p995_p1), [#allocation7], 4294967040  ;;  %p996_p4 = pmov %p995_p1 }
  0x86   : > { %p997_p5 = pmov %p995_p1 }
  0x87   : > { %703 = dma.done.wait (%p996_p4), [#allocation10], 256  }
  0x88   : > { %705 = vsyncadd (%p997_p5), [#allocation10], 4294967040  ;;  %v275_v0 = vld [vmem:[%s227_s22] sm:$0xff]  ;;  %v276_v1 = vld [vmem:[%s227_s22 + $0x8] sm:$0xff]  ;;  %s732_s20 = smov 0.0   ;;  %p998_p10 = pmov %p995_p1 }
  0x89   : > { %v277_v2 = vld [vmem:[%s236_s30] sm:$0xff]  ;;  %v278_v3 = vld [vmem:[%s236_s30 + $0x8] sm:$0xff]  ;;  %p453_p12 = scmp.ne.s32.totalorder %s778_s19, 1 }
  0x8a   : > { %v279_v4 = vsub.f32 %v275_v0, %v277_v2  ;;  %v280_v5 = vsub.f32 %v276_v1, %v278_v3  ;;  %477 = sst [smem:[#allocation2]] (%p998_p10), %s732_s20  ;;  %v303_v16 = vld [vmem:[#allocation9] sm:$0xff] (!%p453_p12)  ;;  %v304_v17 = vld [vmem:[#allocation9 + $0x8] sm:$0xff] (!%p453_p12)  ;;  %v301_v20 = vld [vmem:[#allocation8] sm:$0xff] (!%p453_p12)  ;;  %vm317_vm0 = vcmask (!%p453_p12), 261120  }
  0x8b   : > { %s281_s21 = sld [smem:[#allocation2]]  ;;  %v311_v18 = vmul.f32 (!%p453_p12), 1.442695, %v303_v16  ;;  %v313_v19 = vmul.f32 (!%p453_p12), 1.442695, %v304_v17  ;;  %v302_v21 = vld [vmem:[#allocation8 + $0x8] sm:$0xff] (!%p453_p12)  ;;  %v307_v23 = vmul.f32 (!%p453_p12), %v301_v20, %v301_v20 }
  0x8c   : > { %v282_v6 = vmul.f32 %v279_v4, %v279_v4  ;;  %v283_v7 = vmul.f32 %v280_v5, %v280_v5  ;;  %v305_v22 = vadd.f32 (!%p453_p12), 1.0, %v303_v16  ;;  %v306_v24 = vadd.f32 (!%p453_p12), 1.0, %v304_v17 }
  0x8d   : > { %542 = vpow2.f32 (!%p453_p12), %v311_v18  ;;  %v308_v25 = vmul.f32 (!%p453_p12), %v302_v21, %v302_v21 }
  0x8e   : > { %v284_v8 = vadd.f32 %v283_v7, %v282_v6  ;;  %544 = vpow2.f32 (!%p453_p12), %v313_v19  ;;  %v309_v26 = vsub.f32 (!%p453_p12), %v305_v22, %v307_v23 }
  0x8f   : > { %v310_v27 = vsub.f32 (!%p453_p12), %v306_v24, %v308_v25 }
  0x90   : > { %285 = vadd.xlane.f32.xlu0 %v284_v8 }
  0x97   : > { %v543_v28 = vpop.eup (!%p453_p12), %542 }
  0x98   : > { %v545_v29 = vpop.eup (!%p453_p12), %544  ;;  %v315_v30 = vsub.f32 (!%p453_p12), %v309_v26, %v543_v28 }
  0x99   : > { %v316_v31 = vsub.f32 (!%p453_p12), %v310_v27, %v545_v29 }
  0x9a   : > { %v318_v32 = vsel (!%p453_p12), %vm317_vm0, %v315_v30, 0.0 }
  0x9b   : > { %v319_v33 = vsel (!%p453_p12), %vm317_vm0, %v316_v31, 0.0 }
  0x9c   : > { %v320_v34 = vadd.f32 (!%p453_p12), %v319_v33, %v318_v32 }
  0x9e   : > { %321 = vadd.xlane.f32.xlu0 (!%p453_p12), %v320_v34 }
 0x11d   : > { %v286_v9 = vpop.xlane.xlu0 %285 }
 0x11e   : > { %v287_v10 = vrot.slane %v286_v9, 4 }
 0x120   : > { %v288_v11 = vadd.f32 %v287_v10, %v286_v9 }
 0x122   : > { %v289_v12 = vrot.slane %v288_v11, 2 }
 0x124   : > { %v290_v13 = vadd.f32 %v289_v12, %v288_v11 }
 0x126   : > { %v291_v14 = vrot.slane %v290_v13, 1 }
 0x128   : > { %v292_v15 = vadd.f32 %v291_v14, %v290_v13 }
 0x12a   : > { %460 = vpush %v292_v15 }
 0x12b   : > { %v322_v35 = vpop.xlane.xlu0 (!%p453_p12), %321 }
 0x12c   : > { %v323_v36 = vrot.slane (!%p453_p12), %v322_v35, 4 }
 0x12e   : > { %v324_v37 = vadd.f32 (!%p453_p12), %v323_v36, %v322_v35 }
 0x130   : > { %v325_v38 = vrot.slane (!%p453_p12), %v324_v37, 2 }
 0x132   : > { %v326_v39 = vadd.f32 (!%p453_p12), %v325_v38, %v324_v37 }
 0x134   : > { %v327_v40 = vrot.slane (!%p453_p12), %v326_v39, 1 }
 0x136   : > { %v328_v41 = vadd.f32 (!%p453_p12), %v327_v40, %v326_v39 }
 0x138   : > { %462 = vpush (!%p453_p12), %v328_v41 }
 0x158   : > { %300 = sbr.rel (%p453_p12) target bundleno = 371 (0x173), region = 60 }
 0x15b   : > { %s461_s27 = spop %460 }
 0x15c   : > { %s294_s23 = sadd.f32 %s461_s27, %s281_s21 }
 0x15e   : > { %296 = sst [smem:[#allocation2]] %s294_s23 }
 0x15f   : > { %s332_s29 = sld [smem:[#allocation2]] }
 0x165   : > { %s333_s13 = smul.f32 0.00024414063, %s332_s29 }
 0x169   : > { %s463_s6 = spop %462 }
 0x16a   : > { %s330_s24 = smul.f32 -0.5, %s463_s6 }
 0x16c   : > { %s331_s7 = smul.f32 0.0625, %s330_s24 }
 0x16e   : > { %s334_s12 = smul.f32 0.1, %s331_s7 }
 0x170   : > { %s335_s18 = sadd.f32 %s334_s12, %s333_s13 }
 0x172   : > { %337 = sst [smem:[#allocation11]] %s335_s18 }
 0x173 PF: > { %p502_p0 = scmp.eq.s32.totalorder %s778_s19, 1  ;;  %s662_s10 = scalar_lea.hbm %s984_s4, 16 }
 0x174   : > { %p663_p2 = scmp.ne.s32.totalorder %s984_s4, %s662_s10  ;;  %p668_p8 = scmp.lt.u32.totalorder %s662_s10, %s984_s4 }
 0x176   : > { %p664_p13 = pnand %p663_p2, %p502_p0 }
 0x178   : > { %p665_p3 = pneg %p664_p13 }
 0x17a   : > { %p670_p9 = pnand %p668_p8, %p665_p3 }
 0x17c   : > { %673 = shalt.err (!%p670_p9)
}
 0x17d   : > { %s733_s25 = smov [#allocation11]  }
 0x17e   : > { %479 = dma.smem_to_hbm (%p502_p0), %s733_s25, 16, %s984_s4, [#allocation5]  }
 0x17f   : > { %707 = dma.done.wait (%p502_p0), [#allocation5], 16  }
 0x180   : > { %709 = vsyncadd (%p502_p0), [#allocation5], 4294967280 }
 0x181   : > { %351 = sfence }
 0x182 PF: > { %p19_p6 = scmp.ge.s32.totalorder %s852_s5, 4   ;;  %s999_s15 = smov %s716_s16 }
 0x183   : > { %s1000_s16 = smov %s720_s17  ;;  %s1001_s17 = smov %s863_s8 }
 0x184   : > { %s1002_s18 = smov %s852_s5  ;;  %21 = sbr.rel (!%p19_p6) target bundleno = 7 (0x7), region = 105 }
 0x18b   :  { %357 = vsyncpa [#allocation4], 1 }
 0x18c   :  { %359 = vsyncpa [#allocation4 + $0x1], 1 }
 0x18d   :  { %360 = vsyncpa [#allocation7], 1 }
 0x18e   :  { %362 = vsyncpa [#allocation7 + $0x1], 1 }
 0x18f   :  { %363 = vsyncpa [#allocation10], 1 }
 0x190   :  { %364 = vsyncpa [#allocation5], 1 }
 0x191   :  { %366 = vsyncpa [#allocation5 + $0x1], 1 }

</bundles_post_ra>
